<compile_context>
chip_gen: v5e
topology: v5e:2x2
jax: 0.10.0
libtpu: 0.0.40
codegen_flags: <defaults>
</compile_context>

<pallas_src>
import functools

import jax
import jax.numpy as jnp
from jax.experimental import pallas as pl
from jax.experimental.pallas import tpu as pltpu

_HIDDEN = 256  # hardcoded in the PyTorch module (nn.Linear(state_dim, 256), ...)


def _round_up(x, m):
    return ((x + m - 1) // m) * m


def encoder_kernel(x_ref, w1_ref, w23_ref, b_ref, out_ref):
    """Fused 3-layer MLP encoder: relu(relu(relu(x@w1+b1)@w2+b2)@w3+b3)."""
    H = _HIDDEN
    E_pad = w23_ref.shape[1] - H

    # Cast the state tile to bf16 in-kernel (input arrives in its native dtype).
    x = x_ref[...].astype(jnp.bfloat16)                      # (TB, S)

    # layer 1: [TB,S] @ [S,H] -> f32 accumulate
    h = jnp.dot(x, w1_ref[...], preferred_element_type=jnp.float32)
    h = jnp.maximum(h + b_ref[:, 0:H], 0.0)

    # layer 2: [TB,H] @ [H,H] -> f32  (w2 = first H lanes of the packed w23 blob)
    h = jnp.dot(h.astype(w23_ref.dtype), w23_ref[:, 0:H],
                preferred_element_type=jnp.float32)
    h = jnp.maximum(h + b_ref[:, H:2 * H], 0.0)

    # layer 3: [TB,H] @ [H,E_pad] -> f32 (w3 zero-padded to a lane-dense width)
    h = jnp.dot(h.astype(w23_ref.dtype), w23_ref[:, H:H + E_pad],
                preferred_element_type=jnp.float32)
    # f32 accumulate, narrow only at the final store (bf16 output slab).
    out_ref[...] = jnp.maximum(h + b_ref[:, 2 * H:2 * H + E_pad],
                               0.0).astype(out_ref.dtype)


def init_params(key, state_dim, encoder_dim, hidden=_HIDDEN):
    """Deterministic init mimicking nn.Linear default (uniform +- 1/sqrt(fan_in))."""
    def linear(k, fan_in, fan_out):
        kw, kb = jax.random.split(k)
        bound = 1.0 / jnp.sqrt(fan_in)
        w = jax.random.uniform(kw, (fan_in, fan_out), jnp.float32, -bound, bound)
        b = jax.random.uniform(kb, (1, fan_out), jnp.float32, -bound, bound)
        return w, b

    k1, k2, k3 = jax.random.split(key, 3)
    p = {}
    p["w1"], p["b1"] = linear(k1, state_dim, hidden)
    p["w2"], p["b2"] = linear(k2, hidden, hidden)
    p["w3"], p["b3"] = linear(k3, hidden, encoder_dim)
    return p


def pack_params(params):
    """One-time packing (outside the hot loop):
       - weights -> bf16 MXU operands
       - w2 || w3 fused side-by-side (shared in-dim of 256)
       - all biases packed into one f32 row
       - encoder_dim padded to a lane-dense multiple of 128 (zero columns, exact
         zeros under ReLU).  Deliberately NOT widened beyond that: the kernel is
         memory-bound and extra lanes only grow the dominant output writeback."""
    H = _HIDDEN
    E = params["w3"].shape[1]
    E_pad = _round_up(E, 128)
    w3, b3 = params["w3"], params["b3"]
    if E_pad != E:
        w3 = jnp.pad(w3, ((0, 0), (0, E_pad - E)))
        b3 = jnp.pad(b3, ((0, 0), (0, E_pad - E)))
    return {
        "w1": params["w1"].astype(jnp.bfloat16),
        "w23": jnp.concatenate([params["w2"], w3], axis=1).astype(jnp.bfloat16),
        "b": jnp.concatenate([params["b1"], params["b2"], b3],
                             axis=1).astype(jnp.float32),
    }


def _pick_batch_tile(B, tile_b):
    """Batch tile selection:
       - large B: big tiles (default 2048) so per-grid-step overhead amortizes
       - 16 <= B < 2*tile_b: split into >= 2 programs so both v7x TCs get work
       - tiny B: single full-batch tile (>= 8 rows, sublane granularity)."""
    if B >= 16:
        return min(tile_b, max(16, _round_up(pl.cdiv(B, 2), 16)))
    return max(8, _round_up(B, 8))


def _vmem_budget_bytes(tb, S, H, E_pad):
    """Rough per-core VMEM footprint: double-buffered x/out + resident weights +
       f32 intermediates.  Capped by the caller at v7x's 64 MiB physical VMEM."""
    x_bytes = 2 * tb * S * 4                       # f32 input, double-buffered
    out_bytes = 2 * tb * E_pad * 2                 # bf16 output, double-buffered
    w_bytes = 2 * (S * H * 2 + H * (H + E_pad) * 2 + (2 * H + E_pad) * 4)
    inter_bytes = 4 * tb * H * 4                   # f32 intermediates + bf16 casts
    return x_bytes + out_bytes + w_bytes + inter_bytes


@functools.partial(jax.jit,
                   static_argnames=("encoder_dim", "tile_b", "return_padded"))
def encoder_forward(state, packed, *, encoder_dim, tile_b=2048,
                    return_padded=False):
    """state: [B, state_dim] -> enc: [B, encoder_dim] (bf16).

    If return_padded=True, returns the raw [B_pad, E_pad] slab (pad columns are
    exact zeros; pad ROWS contain relu(bias) - see footgun note above)."""
    H = _HIDDEN
    B, S = state.shape
    E_pad = packed["w23"].shape[1] - H

    tb = _pick_batch_tile(B, tile_b)
    B_pad = _round_up(B, tb)

    x = state
    if B_pad != B:
        x = jnp.pad(x, ((0, B_pad - B), (0, 0)))

    # NOTE: w1/w23/b have constant index_maps so they stay VMEM-resident; their
    # packed footprint is <200 KiB, so we keep default buffering rather than
    # pl.Buffered(1) for maximum lowering compatibility.
    vmem_limit = min(64 * 1024 * 1024,
                     max(32 * 1024 * 1024, 2 * _vmem_budget_bytes(tb, S, H, E_pad)))

    out = pl.pallas_call(
        encoder_kernel,
        out_shape=jax.ShapeDtypeStruct((B_pad, E_pad), jnp.bfloat16),
        grid=(B_pad // tb,),
        in_specs=[
            pl.BlockSpec((tb, S), lambda i: (i, 0)),              # activations: tiled on batch
            pl.BlockSpec((S, H), lambda i: (0, 0)),               # w1: VMEM-resident
            pl.BlockSpec((H, H + E_pad), lambda i: (0, 0)),       # packed w2||w3
            pl.BlockSpec((1, 2 * H + E_pad), lambda i: (0, 0)),   # packed biases
        ],
        out_specs=pl.BlockSpec((tb, E_pad), lambda i: (i, 0)),    # lane-dense bf16 slab
        compiler_params=pltpu.CompilerParams(
            dimension_semantics=("parallel",),                    # megacore on v7x
            vmem_limit_bytes=int(vmem_limit)),
    )(x, packed["w1"], packed["w23"], packed["b"])

    if return_padded:
        return out
    if B_pad == B and E_pad == encoder_dim:
        return out                                 # no extra HBM pass needed
    return out[:B, :encoder_dim]


def encoder_forward_ref(state, params):
    """Pure-JAX reference with matching numerics (bf16 operands, f32 accumulate)."""
    bf, f32 = jnp.bfloat16, jnp.float32
    h = jnp.dot(state.astype(bf), params["w1"].astype(bf), preferred_element_type=f32)
    h = jnp.maximum(h + params["b1"], 0.0)
    h = jnp.dot(h.astype(bf), params["w2"].astype(bf), preferred_element_type=f32)
    h = jnp.maximum(h + params["b2"], 0.0)
    h = jnp.dot(h.astype(bf), params["w3"].astype(bf), preferred_element_type=f32)
    return jnp.maximum(h + params["b3"], 0.0)


if __name__ == "__main__":
    key = jax.random.PRNGKey(0)
    k_param, k_state = jax.random.split(key)

    # batch=64 exercises the >=2-program grid split (v7x megacore path).
    batch, state_dim, encoder_dim = 64, 12, 64
    params = init_params(k_param, state_dim, encoder_dim)
    packed = pack_params(params)

    state = jax.random.normal(k_state, (batch, state_dim), jnp.float32)

    enc = encoder_forward(state, packed, encoder_dim=encoder_dim)
    jax.block_until_ready(enc)

    enc_ref = encoder_forward_ref(state, params)
    assert enc.shape == (batch, encoder_dim)
    assert enc.dtype == jnp.bfloat16
    err = float(jnp.max(jnp.abs(enc.astype(jnp.float32) - enc_ref)))
    assert err < 2e-2, "max abs err = %f" % err

    print("KERNEL_OK")
</pallas_src>

<mosaic_0001>
module attributes {stable_mosaic.version = 11 : i64} {
  func.func @encoder_kernel(%arg0: i32, %arg1: memref<32x12xf32, #tpu.memory_space<vmem>>, %arg2: memref<12x256xbf16, #tpu.memory_space<vmem>>, %arg3: memref<256x384xbf16, #tpu.memory_space<vmem>>, %arg4: memref<1x640xf32, #tpu.memory_space<vmem>>, %arg5: memref<32x128xbf16, #tpu.memory_space<vmem>>) attributes {dimension_semantics = [#tpu.dimension_semantics<parallel>], iteration_bounds = array<i64: 2>, scalar_prefetch = 0 : i64, scratch_operands = 0 : i64, tpu.core_type = #tpu.core_type<tc>, window_params = [{transform_indices = @transform_0, window_bounds = array<i64: 32, 12>}, {pipeline_mode = #tpu.pipeline_mode<synchronous>, transform_indices = @transform_1, window_bounds = array<i64: 12, 256>}, {pipeline_mode = #tpu.pipeline_mode<synchronous>, transform_indices = @transform_2, window_bounds = array<i64: 256, 384>}, {pipeline_mode = #tpu.pipeline_mode<synchronous>, transform_indices = @transform_3, window_bounds = array<i64: 1, 640>}, {transform_indices = @transform_4, window_bounds = array<i64: 32, 128>}]} {
    %c0 = arith.constant 0 : index
    %c0_0 = arith.constant 0 : index
    %0 = vector.load %arg1[%c0, %c0_0] : memref<32x12xf32, #tpu.memory_space<vmem>>, vector<32x12xf32>
    %1 = arith.truncf %0 : vector<32x12xf32> to vector<32x12xbf16>
    %c0_1 = arith.constant 0 : index
    %c0_2 = arith.constant 0 : index
    %2 = vector.load %arg2[%c0_1, %c0_2] : memref<12x256xbf16, #tpu.memory_space<vmem>>, vector<12x256xbf16>
    %cst = arith.constant dense<0.000000e+00> : vector<32x256xf32>
    %3 = tpu.matmul %1, %2, %cst {dimension_numbers = #tpu.dot_dimension_numbers<[1], [0], [0], [1], [0, 0, 1, 1], [], []>} : vector<32x12xbf16>, vector<12x256xbf16>, vector<32x256xf32> -> vector<32x256xf32>
    %c0_3 = arith.constant 0 : index
    %c0_4 = arith.constant 0 : index
    %4 = vector.load %arg4[%c0_3, %c0_4] : memref<1x640xf32, #tpu.memory_space<vmem>>, vector<1x256xf32>
    %5 = vector.broadcast %4 : vector<1x256xf32> to vector<32x256xf32>
    %6 = arith.addf %3, %5 : vector<32x256xf32>
    %cst_5 = arith.constant 0.000000e+00 : f32
    %7 = vector.broadcast %cst_5 : f32 to vector<32x256xf32>
    %8 = arith.maximumf %6, %7 : vector<32x256xf32>
    %9 = arith.truncf %8 : vector<32x256xf32> to vector<32x256xbf16>
    %c0_6 = arith.constant 0 : index
    %c0_7 = arith.constant 0 : index
    %10 = vector.load %arg3[%c0_6, %c0_7] : memref<256x384xbf16, #tpu.memory_space<vmem>>, vector<256x256xbf16>
    %cst_8 = arith.constant dense<0.000000e+00> : vector<32x256xf32>
    %11 = tpu.matmul %9, %10, %cst_8 {dimension_numbers = #tpu.dot_dimension_numbers<[1], [0], [0], [1], [0, 0, 1, 1], [], []>} : vector<32x256xbf16>, vector<256x256xbf16>, vector<32x256xf32> -> vector<32x256xf32>
    %c0_9 = arith.constant 0 : index
    %c256 = arith.constant 256 : index
    %12 = vector.load %arg4[%c0_9, %c256] : memref<1x640xf32, #tpu.memory_space<vmem>>, vector<1x256xf32>
    %13 = vector.broadcast %12 : vector<1x256xf32> to vector<32x256xf32>
    %14 = arith.addf %11, %13 : vector<32x256xf32>
    %cst_10 = arith.constant 0.000000e+00 : f32
    %15 = vector.broadcast %cst_10 : f32 to vector<32x256xf32>
    %16 = arith.maximumf %14, %15 : vector<32x256xf32>
    %17 = arith.truncf %16 : vector<32x256xf32> to vector<32x256xbf16>
    %c0_11 = arith.constant 0 : index
    %c256_12 = arith.constant 256 : index
    %18 = vector.load %arg3[%c0_11, %c256_12] : memref<256x384xbf16, #tpu.memory_space<vmem>>, vector<256x128xbf16>
    %cst_13 = arith.constant dense<0.000000e+00> : vector<32x128xf32>
    %19 = tpu.matmul %17, %18, %cst_13 {dimension_numbers = #tpu.dot_dimension_numbers<[1], [0], [0], [1], [0, 0, 1, 1], [], []>} : vector<32x256xbf16>, vector<256x128xbf16>, vector<32x128xf32> -> vector<32x128xf32>
    %c0_14 = arith.constant 0 : index
    %c512 = arith.constant 512 : index
    %20 = vector.load %arg4[%c0_14, %c512] : memref<1x640xf32, #tpu.memory_space<vmem>>, vector<1x128xf32>
    %21 = vector.broadcast %20 : vector<1x128xf32> to vector<32x128xf32>
    %22 = arith.addf %19, %21 : vector<32x128xf32>
    %cst_15 = arith.constant 0.000000e+00 : f32
    %23 = vector.broadcast %cst_15 : f32 to vector<32x128xf32>
    %24 = arith.maximumf %22, %23 : vector<32x128xf32>
    %25 = arith.truncf %24 : vector<32x128xf32> to vector<32x128xbf16>
    %c0_16 = arith.constant 0 : index
    %c0_17 = arith.constant 0 : index
    %26 = vector.load %arg5[%c0_16, %c0_17] : memref<32x128xbf16, #tpu.memory_space<vmem>>, vector<32x128xbf16>
    tpu.vector_store %arg5[%c0_16, %c0_17], %25 {strides = array<i32>} : memref<32x128xbf16, #tpu.memory_space<vmem>>, vector<32x128xbf16>,
    return
  }
  func.func @transform_0(%arg0: i32) -> (i32, i32) {
    %c0_i32 = arith.constant 0 : i32
    %c0_i32_0 = arith.constant 0 : i32
    return %arg0, %c0_i32 : i32, i32
  }
  func.func @transform_1(%arg0: i32) -> (i32, i32) {
    %c0_i32 = arith.constant 0 : i32
    %c0_i32_0 = arith.constant 0 : i32
    %c0_i32_1 = arith.constant 0 : i32
    return %c0_i32, %c0_i32_0 : i32, i32
  }
  func.func @transform_2(%arg0: i32) -> (i32, i32) {
    %c0_i32 = arith.constant 0 : i32
    %c0_i32_0 = arith.constant 0 : i32
    %c0_i32_1 = arith.constant 0 : i32
    return %c0_i32, %c0_i32_0 : i32, i32
  }
  func.func @transform_3(%arg0: i32) -> (i32, i32) {
    %c0_i32 = arith.constant 0 : i32
    %c0_i32_0 = arith.constant 0 : i32
    %c0_i32_1 = arith.constant 0 : i32
    return %c0_i32, %c0_i32_0 : i32, i32
  }
  func.func @transform_4(%arg0: i32) -> (i32, i32) {
    %c0_i32 = arith.constant 0 : i32
    %c0_i32_0 = arith.constant 0 : i32
    return %arg0, %c0_i32 : i32, i32
  }
}

</mosaic_0001>

<bundles_post_ra>
// kernel: encoder_forward.1
= control target key start
LH: loop header
LB: loop body
LE: loop exit
PB: predicated region body
PF: predicated region fallthrough
CT: control target
= control target key end

     0   :  { %9 = vsyncpa [#allocation3], 0  ;;  %s1471_s0 = inlined_call_operand.vmem [shape: f32[64,12], index: 0, kind: input, shape index: {}]   ;;  %s1472_s1 = inlined_call_operand.vmem [shape: bf16[12,256], index: 1, kind: input, shape index: {}]   ;;  %s1473_s2 = inlined_call_operand.hbm [shape: bf16[256,384], index: 2, kind: input, shape index: {}]   ;;  %s1474_s3 = inlined_call_operand.vmem [shape: f32[1,640], index: 3, kind: input, shape index: {}]   ;;  %s1475_s4 = inlined_call_operand.hbm [shape: bf16[64,128], index: 4, kind: output, shape index: {}]  }
   0x1   :  { %10 = vsyncpa [#allocation4], 0 }
   0x2   :  { %12 = vsyncpa [#allocation4 + $0x1], 0  ;;  %s1340_s15 = smov 0   ;;  %s1342_s16 = smov 0  }
   0x3   :  { %s1344_s17 = smov 0   ;;  %s1346_s18 = smov 0  }
   0x4 LB: > { %s1361_s19 = sadd.s32 4294967295, %s1308_s18   ;;  %s861_s20 = sadd.s32 4294967294, %s1308_s18   ;;  %s1308_s18 = sphi %s1346_s18, %s1481_s18   ;;  %s1304_s17 = sphi %s1344_s17, %s1480_s17   ;;  %s1300_s16 = sphi %s1342_s16, %s1479_s16   ;;  %s1296_s15 = sphi %s1340_s15, %s1478_s15  }
   0x5   : > { %s1365_s21 = sadd.s32 1, %s1308_s18   ;;  %s114_s22 = sadd.s32 1, %s1304_s17 }
   0x6   : > { %s111_s23 = ssub.s32 %s1308_s18, %s1365_s21  ;;  %p124_p0 = scmp.ne.s32.totalorder %s1304_s17, %s1300_s16 }
   0x7   : > { %p112_p1 = scmp.eq.s32.totalorder %s111_s23, 0  ;;  %p125_p2 = scmp.eq.s32.totalorder %s1361_s19, 1 }
   0x8   : > { %p130_p3 = scmp.ne.s32.totalorder %s1300_s16, %s1296_s15  ;;  %p131_p4 = scmp.eq.s32.totalorder %s861_s20, 1 }
   0x9   : > { %s1376_s24 = scalar_select %p112_p1, %s1304_s17, %s114_s22  }
   0xa   : > { %p1378_p5 = por %p125_p2, %p124_p0  ;;  %p1382_p6 = por %p131_p4, %p130_p3 }
   0xb   : > { %p862_p7 = scmp.ge.s32.totalorder %s1308_s18, 1  ;;  %p138_p8 = scmp.lt.s32.totalorder %s1308_s18, 3 }
   0xc   : > { %p1171_p9 = scmp.eq.s32.totalorder %s1361_s19, 0  ;;  %s152_s29 = sshll.u32 %s1473_s2, 4  ;;  %s153_s29 = int_to_ptr.hbm [resolvable:$true] %s152_s29 }
   0xd   : > { %p139_p10 = pnand %p862_p7, %p138_p8  ;;  %s1310_s30 = smov [#allocation2]  }
   0xe   : > { %s154_s5 = sshll.u32 %s1310_s30, 4  ;;  %s1311_s6 = smov 192   ;;  %s155_s5 = int_to_ptr.vmem [resolvable:$true] %s154_s5 }
   0xf   : > { %p1163_p11 = pneg %p139_p10  ;;  %s1312_s7 = smov 12  }
  0x10   : > { %182 = sbr.rel (%p139_p10) target bundleno = 487 (0x1e7), region = 36 }
  0x11   : > { %p1164_p12 = pnand %p1171_p9, %p1163_p11 }
  0x13   : > { %1166 = dma.hbm_to_vmem [thread:$0]  (!%p1164_p12), %s153_s29, 6144, %s155_s5, [#allocation3], %s1311_s6, %s1311_s6, %s1312_s7  }
  0x15   : > { %1287 = dma.done.wait (%p1171_p9), [#allocation3], 6144  }
  0x16   : > { %1289 = vsyncadd (%p1171_p9), [#allocation3], 4294961152  ;;  %s868_s8 = sshll.u32 %s1361_s19, 2  ;;  %vm246_vm0 = vcmask 1045504   ;;  %v872_v0 = vld [vmem:[%s1472_s1] sm:$0xf] }
  0x17   : > { %p210_p13 = scmp.lt.s32.totalorder %s868_s8, 7  ;;  %v1080_v1 = vld [vmem:[%s1472_s1 + $0x4] sm:$0x30]  ;;  %v1079_v2 = vld [vmem:[%s1472_s1 + $0x4] sm:$0xf]  ;;  %vm239_vm1 = vcmask 97280  }
  0x18   : > { %v873_v3 = vor.u32 %v1080_v1, %v872_v0  ;;  %v874_v4 = vld [vmem:[%s1472_s1 + $0x8] sm:$0x30]  ;;  %v940_v8 = vld [vmem:[#allocation2 + $0xa8] sm:$0xf]  ;;  %v1096_v11 = vld [vmem:[#allocation2 + $0xb0] sm:$0xf0] }
  0x19   : > { %s1483_s8 = smov (!%p210_p13, %s868_s8), 7  ;;  %v877_v7 = vor.u32 %v1079_v2, %v874_v4  ;;  %v1004_v12 = vld [vmem:[#allocation2 + $0x168] sm:$0xf]  ;;  %v941_v14 = vor.u32 %v1096_v11, %v940_v8  ;;  %v1112_v15 = vld [vmem:[#allocation2 + $0x170] sm:$0xf0]  ;;  %s206_s10 = sand.u32 1, %s1300_s16  }
  0x1a   : > { %s869_s9 = sshll.u32 %s1483_s8, 3  ;;  %v248_v9 = vsel %vm246_vm0, %v873_v3, 0  ;;  %v1095_v16 = vld [vmem:[#allocation2 + $0xac] sm:$0xf]  ;;  %v1005_v17 = vor.u32 %v1112_v15, %v1004_v12  ;;  %v942_v18 = vld [vmem:[#allocation2 + $0xb4] sm:$0xf0] }
  0x1b   : > { %s1402_s12 = scalar_lea.vmem %s1471_s0, %s869_s9  ;;  %260 = vmatpush.bf16.msra.mxu0 %v248_v9  ;;  %v251_v13 = vsel %vm246_vm0, %v877_v7, 0  ;;  %v1111_v19 = vld [vmem:[#allocation2 + $0x16c] sm:$0xf]  ;;  %v1006_v20 = vld [vmem:[#allocation2 + $0x174] sm:$0xf0]  ;;  %501 = vmatpush.bf16.msra.mxu2 %v941_v14  ;;  %v945_v21 = vor.u32 %v1095_v16, %v942_v18  ;;  %s867_s11 = sshll.u32 %s206_s10, 4 }
  0x1c   : > { %v217_v5 = vld [vmem:[%s1402_s12] sm:$0xff]  ;;  %v218_v6 = vld [vmem:[%s1402_s12 + $0x8] sm:$0xff]  ;;  %279 = vmatpush.bf16.msra.mxu1 %v251_v13  ;;  %v1009_v22 = vor.u32 %v1111_v19, %v1006_v20  ;;  %v932_v23 = vld [vmem:[#allocation2 + $0x90] sm:$0xf]  ;;  %520 = vmatpush.bf16.msra.mxu3 %v1005_v17  ;;  %s1129_s13 = sshll.u32 %s1361_s19, 4  ;;  %s772_s19 = scalar_lea.sflag [#allocation4], %s206_s10 }
  0x1d   : > { %v221_v10 = vpack.c.bf16 %v218_v6, %v217_v5  ;;  %v1094_v24 = vld [vmem:[#allocation2 + $0x98] sm:$0xf0]  ;;  %v996_v25 = vld [vmem:[#allocation2 + $0x150] sm:$0xf]  ;;  %v1093_v28 = vld [vmem:[#allocation2 + $0x94] sm:$0xf]  ;;  %s783_s22 = scalar_lea.hbm %s1475_s4, %s1129_s13 }
  0x1e   : > { %v933_v26 = vor.u32 %v1094_v24, %v932_v23  ;;  %v1110_v27 = vld [vmem:[#allocation2 + $0x158] sm:$0xf0]  ;;  %v934_v29 = vld [vmem:[#allocation2 + $0x9c] sm:$0xf0]  ;;  %v1109_v32 = vld [vmem:[#allocation2 + $0x154] sm:$0xf] }
  0x1f   : > { %878 = vmatmul.msk.bf16.vlgmr.msra.gmra.mxu0 %vm239_vm1, %v221_v10  ;;  %880 = vmatmul.msk.bf16.vlgmr.msra.gmra.mxu1 %vm239_vm1, %v221_v10  ;;  %v997_v30 = vor.u32 %v1110_v27, %v996_v25  ;;  %v937_v31 = vor.u32 %v1093_v28, %v934_v29  ;;  %v998_v33 = vld [vmem:[#allocation2 + $0x15c] sm:$0xf0]  ;;  %v924_v34 = vld [vmem:[#allocation2 + $0x78] sm:$0xf]  ;;  %v1092_v36 = vld [vmem:[#allocation2 + $0x80] sm:$0xf0] }
  0x20   : > { %539 = vmatpush.bf16.msrb.mxu0 %v945_v21  ;;  %558 = vmatpush.bf16.msrb.mxu1 %v1009_v22  ;;  %v1001_v35 = vor.u32 %v1109_v32, %v998_v33  ;;  %v988_v37 = vld [vmem:[#allocation2 + $0x138] sm:$0xf]  ;;  %v1108_v38 = vld [vmem:[#allocation2 + $0x140] sm:$0xf0]  ;;  %v925_v39 = vor.u32 %v1092_v36, %v924_v34  ;;  %v1091_v40 = vld [vmem:[#allocation2 + $0x7c] sm:$0xf] }
  0x21   : > { %502 = vmatpush.bf16.msra.mxu2 %v933_v26  ;;  %v926_v41 = vld [vmem:[#allocation2 + $0x84] sm:$0xf0]  ;;  %v1107_v42 = vld [vmem:[#allocation2 + $0x13c] sm:$0xf]  ;;  %521 = vmatpush.bf16.msra.mxu3 %v997_v30  ;;  %v989_v43 = vor.u32 %v1108_v38, %v988_v37  ;;  %v916_v45 = vld [vmem:[#allocation2 + $0x60] sm:$0xf] }
  0x22   : > { %v990_v44 = vld [vmem:[#allocation2 + $0x144] sm:$0xf0]  ;;  %v1090_v46 = vld [vmem:[#allocation2 + $0x68] sm:$0xf0]  ;;  %v929_v47 = vor.u32 %v1091_v40, %v926_v41  ;;  %v980_v48 = vld [vmem:[#allocation2 + $0x120] sm:$0xf] }
  0x23   : > { %v1106_v49 = vld [vmem:[#allocation2 + $0x128] sm:$0xf0]  ;;  %v993_v50 = vor.u32 %v1107_v42, %v990_v44  ;;  %v1089_v51 = vld [vmem:[#allocation2 + $0x64] sm:$0xf]  ;;  %v918_v52 = vld [vmem:[#allocation2 + $0x6c] sm:$0xf0]  ;;  %v917_v53 = vor.u32 %v1090_v46, %v916_v45 }
  0x24   : > { %540 = vmatpush.bf16.msrb.mxu0 %v937_v31  ;;  %559 = vmatpush.bf16.msrb.mxu1 %v1001_v35  ;;  %v1105_v54 = vld [vmem:[#allocation2 + $0x124] sm:$0xf]  ;;  %v982_v55 = vld [vmem:[#allocation2 + $0x12c] sm:$0xf0]  ;;  %v981_v56 = vor.u32 %v1106_v49, %v980_v48  ;;  %v220_v58 = vld [vmem:[%s1402_s12 + $0x18] sm:$0xff]  ;;  %v921_v59 = vor.u32 %v1089_v51, %v918_v52  ;;  %s786_s27 = sshll.u32 %s783_s22, 4  ;;  %s787_s27 = int_to_ptr.hbm [resolvable:$true] %s786_s27 }
  0x25   : > { %503 = vmatpush.bf16.msra.mxu2 %v925_v39  ;;  %522 = vmatpush.bf16.msra.mxu3 %v989_v43  ;;  %v219_v57 = vld [vmem:[%s1402_s12 + $0x10] sm:$0xff]  ;;  %v985_v60 = vor.u32 %v1105_v54, %v982_v55  ;;  %v908_v62 = vld [vmem:[#allocation2 + $0x48] sm:$0xf]  ;;  %v1087_v3 = vld [vmem:[#allocation2 + $0x4c] sm:$0xf]  ;;  %s208_s12 = scalar_lea.vmem [#allocation5], %s867_s11 }
  0x26   : > { %v222_v61 = vpack.c.bf16 %v220_v58, %v219_v57  ;;  %v1088_v63 = vld [vmem:[#allocation2 + $0x50] sm:$0xf0]  ;;  %v972_v0 = vld [vmem:[#allocation2 + $0x108] sm:$0xf]  ;;  %v910_v4 = vld [vmem:[#allocation2 + $0x54] sm:$0xf0] }
  0x27   : > { %v909_v1 = vor.u32 %v1088_v63, %v908_v62  ;;  %v1104_v2 = vld [vmem:[#allocation2 + $0x110] sm:$0xf0]  ;;  %v913_v6 = vor.u32 %v1087_v3, %v910_v4  ;;  %v1103_v7 = vld [vmem:[#allocation2 + $0x10c] sm:$0xf]  ;;  %v974_v8 = vld [vmem:[#allocation2 + $0x114] sm:$0xf0] }
  0x28   : > { %541 = vmatpush.bf16.msrb.mxu0 %v929_v47  ;;  %560 = vmatpush.bf16.msrb.mxu1 %v993_v50  ;;  %v973_v5 = vor.u32 %v1104_v2, %v972_v0  ;;  %v977_v9 = vor.u32 %v1103_v7, %v974_v8  ;;  %v900_v10 = vld [vmem:[#allocation2 + $0x30] sm:$0xf]  ;;  %v1086_v11 = vld [vmem:[#allocation2 + $0x38] sm:$0xf0]  ;;  %v1085_v15 = vld [vmem:[#allocation2 + $0x34] sm:$0xf] }
  0x29   : > { %504 = vmatpush.bf16.msra.mxu2 %v917_v53  ;;  %523 = vmatpush.bf16.msra.mxu3 %v981_v56  ;;  %v901_v12 = vor.u32 %v1086_v11, %v900_v10  ;;  %v964_v13 = vld [vmem:[#allocation2 + $0xf0] sm:$0xf]  ;;  %v1102_v14 = vld [vmem:[#allocation2 + $0xf8] sm:$0xf0]  ;;  %v902_v17 = vld [vmem:[#allocation2 + $0x3c] sm:$0xf0] }
  0x2a   : > { %v965_v16 = vor.u32 %v1102_v14, %v964_v13  ;;  %v1101_v18 = vld [vmem:[#allocation2 + $0xf4] sm:$0xf]  ;;  %v966_v19 = vld [vmem:[#allocation2 + $0xfc] sm:$0xf0]  ;;  %v905_v20 = vor.u32 %v1085_v15, %v902_v17  ;;  %v892_v22 = vld [vmem:[#allocation2 + $0x18] sm:$0xf] }
  0x2b   : > { %v969_v21 = vor.u32 %v1101_v18, %v966_v19  ;;  %v1084_v23 = vld [vmem:[#allocation2 + $0x20] sm:$0xf0]  ;;  %v956_v24 = vld [vmem:[#allocation2 + $0xd8] sm:$0xf]  ;;  %v1083_v27 = vld [vmem:[#allocation2 + $0x1c] sm:$0xf] }
  0x2c   : > { %542 = vmatpush.bf16.msrb.mxu0 %v921_v59  ;;  %561 = vmatpush.bf16.msrb.mxu1 %v985_v60  ;;  %v893_v25 = vor.u32 %v1084_v23, %v892_v22  ;;  %v1100_v26 = vld [vmem:[#allocation2 + $0xe0] sm:$0xf0]  ;;  %v894_v28 = vld [vmem:[#allocation2 + $0x24] sm:$0xf0]  ;;  %v1099_v31 = vld [vmem:[#allocation2 + $0xdc] sm:$0xf] }
  0x2d   : > { %505 = vmatpush.bf16.msra.mxu2 %v909_v1  ;;  %524 = vmatpush.bf16.msra.mxu3 %v973_v5  ;;  %v957_v29 = vor.u32 %v1100_v26, %v956_v24  ;;  %v897_v30 = vor.u32 %v1083_v27, %v894_v28  ;;  %v958_v32 = vld [vmem:[#allocation2 + $0xe4] sm:$0xf0]  ;;  %v884_v34 = vld [vmem:[#allocation2] sm:$0xf]  ;;  %v1082_v35 = vld [vmem:[#allocation2 + $0x8] sm:$0xf0] }
  0x2e   : > { %v961_v33 = vor.u32 %v1099_v31, %v958_v32  ;;  %v948_v36 = vld [vmem:[#allocation2 + $0xc0] sm:$0xf]  ;;  %v885_v37 = vor.u32 %v1082_v35, %v884_v34  ;;  %v1098_v38 = vld [vmem:[#allocation2 + $0xc8] sm:$0xf0]  ;;  %v1081_v39 = vld [vmem:[#allocation2 + $0x4] sm:$0xf] }
  0x2f   : > { %879 = vmatmul.msk.bf16.gmra.mxu0 %vm239_vm1, %v222_v61  ;;  %881 = vmatmul.msk.bf16.gmra.mxu1 %vm239_vm1, %v222_v61  ;;  %v886_v40 = vld [vmem:[#allocation2 + $0xc] sm:$0xf0]  ;;  %v949_v41 = vor.u32 %v1098_v38, %v948_v36  ;;  %v1097_v43 = vld [vmem:[#allocation2 + $0xc4] sm:$0xf]  ;;  %v225_v46 = vld [vmem:[%s1474_s3] sm:$0x3] }
  0x30   : > { %543 = vmatpush.bf16.msrb.mxu0 %v913_v6  ;;  %562 = vmatpush.bf16.msrb.mxu1 %v977_v9  ;;  %v889_v42 = vor.u32 %v1081_v39, %v886_v40  ;;  %v950_v44 = vld [vmem:[#allocation2 + $0xcc] sm:$0xf0]  ;;  %v1128_v49 = vld [vmem:[#allocation2 + $0x178] sm:$0xf0]  ;;  %v1068_v50 = vld [vmem:[#allocation2 + $0x158] sm:$0xf] }
  0x31   : > { %506 = vmatpush.bf16.msra.mxu2 %v901_v12  ;;  %525 = vmatpush.bf16.msra.mxu3 %v965_v16  ;;  %v953_v45 = vor.u32 %v1097_v43, %v950_v44  ;;  %v1072_v48 = vld [vmem:[#allocation2 + $0x170] sm:$0xf]  ;;  %v1127_v53 = vld [vmem:[#allocation2 + $0x160] sm:$0xf0]  ;;  %v1120_v55 = vld [vmem:[#allocation2 + $0xb8] sm:$0xf0] }
  0x32   : > { %v1073_v52 = vor.u32 %v1128_v49, %v1072_v48  ;;  %v1040_v54 = vld [vmem:[#allocation2 + $0xb0] sm:$0xf]  ;;  %v1036_v57 = vld [vmem:[#allocation2 + $0x98] sm:$0xf]  ;;  %v227_v58 = vperm.slane %v225_v46, 0  ;;  %v1069_v59 = vor.u32 %v1127_v53, %v1068_v50  ;;  %v228_v61 = vperm.slane %v225_v46, 1 }
  0x33   : > { %v1041_v56 = vor.u32 %v1120_v55, %v1040_v54  ;;  %v1119_v60 = vld [vmem:[#allocation2 + $0xa0] sm:$0xf0]  ;;  %v1064_v62 = vld [vmem:[#allocation2 + $0x140] sm:$0xf]  ;;  %v1126_v63 = vld [vmem:[#allocation2 + $0x148] sm:$0xf0] }
  0x34   : > { %544 = vmatpush.bf16.msrb.mxu0 %v905_v20  ;;  %563 = vmatpush.bf16.msrb.mxu1 %v969_v21  ;;  %v1037_v0 = vor.u32 %v1119_v60, %v1036_v57  ;;  %v1065_v2 = vor.u32 %v1126_v63, %v1064_v62  ;;  %v1060_v8 = vld [vmem:[#allocation2 + $0x128] sm:$0xf]  ;;  %v1125_v9 = vld [vmem:[#allocation2 + $0x130] sm:$0xf0]  ;;  %v1032_v31 = vld [vmem:[#allocation2 + $0x80] sm:$0xf] }
  0x35   : > { %507 = vmatpush.bf16.msra.mxu2 %v893_v25  ;;  %526 = vmatpush.bf16.msra.mxu3 %v957_v29  ;;  %v1061_v15 = vor.u32 %v1125_v9, %v1060_v8  ;;  %v1118_v32 = vld [vmem:[#allocation2 + $0x88] sm:$0xf0]  ;;  %v1056_v34 = vld [vmem:[#allocation2 + $0x110] sm:$0xf]  ;;  %v1124_v35 = vld [vmem:[#allocation2 + $0x118] sm:$0xf0] }
  0x36   : > { %v1057_v36 = vor.u32 %v1124_v35, %v1056_v34  ;;  %v1117_v38 = vld [vmem:[#allocation2 + $0x70] sm:$0xf0]  ;;  %v1052_v40 = vld [vmem:[#allocation2 + $0xf8] sm:$0xf]  ;;  %v1024_v43 = vld [vmem:[#allocation2 + $0x50] sm:$0xf] }
  0x37   : > { %v1116_v44 = vld [vmem:[#allocation2 + $0x58] sm:$0xf0]  ;;  %v1048_v46 = vld [vmem:[#allocation2 + $0xe0] sm:$0xf]  ;;  %v1020_v49 = vld [vmem:[#allocation2 + $0x38] sm:$0xf] }
  0x38   : > { %545 = vmatpush.bf16.msrb.mxu0 %v897_v30  ;;  %564 = vmatpush.bf16.msrb.mxu1 %v961_v33  ;;  %v1033_v33 = vor.u32 %v1118_v32, %v1032_v31  ;;  %v1115_v50 = vld [vmem:[#allocation2 + $0x40] sm:$0xf0]  ;;  %v1121_v53 = vld [vmem:[#allocation2 + $0xd0] sm:$0xf0]  ;;  %v1016_v55 = vld [vmem:[#allocation2 + $0x20] sm:$0xf] }
  0x39   : > { %508 = vmatpush.bf16.msra.mxu2 %v885_v37  ;;  %527 = vmatpush.bf16.msra.mxu3 %v949_v41  ;;  %v1028_v37 = vld [vmem:[#allocation2 + $0x68] sm:$0xf]  ;;  %v1123_v41 = vld [vmem:[#allocation2 + $0x100] sm:$0xf0]  ;;  %s784_s23 = sshll.u32 %s208_s12, 4  ;;  %s1256_s28 = sshra.s32 %s787_s27, 4  ;;  %s785_s23 = int_to_ptr.vmem [resolvable:$true] %s784_s23  ;;  %s1257_s28 = int_to_ptr.hbm [resolvable:$true] %s1256_s28 }
  0x3a   : > { %v1029_v39 = vor.u32 %v1117_v38, %v1028_v37  ;;  %s1258_s29 = scalar_lea.hbm %s1257_s28, 16  ;;  %s1262_s6 = scalar_lea.hbm %s1475_s4, 32 }
  0x3b   : > { %p1259_p0 = scmp.ne.s32.totalorder %s1257_s28, %s1258_s29  ;;  %p1263_p3 = scmp.lt.s32.totalorder %s1257_s28, %s1475_s4 }
  0x3c   : > { %546 = vmatpush.bf16.msrb.mxu0 %v889_v42  ;;  %565 = vmatpush.bf16.msrb.mxu1 %v953_v45  ;;  %v1053_v42 = vor.u32 %v1123_v41, %v1052_v40  ;;  %v1025_v45 = vor.u32 %v1116_v44, %v1024_v43  ;;  %p1264_p4 = scmp.lt.s32.totalorder %s1262_s6, %s1258_s29 }
  0x3d   : > { %1149 = vmatpush.bf16.msrb.mxu3 %v1073_v52  ;;  %1141 = vmatpush.bf16.msrb.mxu2 %v1041_v56  ;;  %p1260_p1 = pnand %p1259_p0, %p1378_p5 }
  0x3e   : > { %p1265_p7 = por %p1264_p4, %p1263_p3 }
  0x3f   : > { %p1261_p2 = pneg %p1260_p1 }
  0x40   : > { %740 = vmatpush.bf16.msra.mxu1 %v1073_v52  ;;  %721 = vmatpush.bf16.msra.mxu0 %v1041_v56  ;;  %v1044_v52 = vld [vmem:[#allocation2 + $0xc8] sm:$0xf]  ;;  %v1114_v56 = vld [vmem:[#allocation2 + $0x28] sm:$0xf0] }
  0x41   : > { %1150 = vmatpush.bf16.msrb.mxu3 %v1069_v59  ;;  %1142 = vmatpush.bf16.msrb.mxu2 %v1037_v0  ;;  %v1045_v54 = vor.u32 %v1121_v53, %v1044_v52  ;;  %v1017_v57 = vor.u32 %v1114_v56, %v1016_v55  ;;  %p1266_p8 = pnand %p1265_p7, %p1261_p2 }
  0x44   : > { %741 = vmatpush.bf16.msra.mxu1 %v1069_v59  ;;  %722 = vmatpush.bf16.msra.mxu0 %v1037_v0  ;;  %v1113_v59 = vld [vmem:[#allocation2 + $0x10] sm:$0xf0] }
  0x45   : > { %1151 = vmatpush.bf16.msrb.mxu3 %v1065_v2  ;;  %1143 = vmatpush.bf16.msrb.mxu2 %v1033_v33 }
  0x48   : > { %742 = vmatpush.bf16.msra.mxu1 %v1065_v2  ;;  %723 = vmatpush.bf16.msra.mxu0 %v1033_v33 }
  0x49   : > { %1152 = vmatpush.bf16.msrb.mxu3 %v1061_v15  ;;  %1144 = vmatpush.bf16.msrb.mxu2 %v1029_v39 }
  0x4c   : > { %743 = vmatpush.bf16.msra.mxu1 %v1061_v15  ;;  %724 = vmatpush.bf16.msra.mxu0 %v1029_v39 }
  0x4d   : > { %1153 = vmatpush.bf16.msrb.mxu3 %v1057_v36  ;;  %1145 = vmatpush.bf16.msrb.mxu2 %v1025_v45 }
  0x50   : > { %744 = vmatpush.bf16.msra.mxu1 %v1057_v36  ;;  %725 = vmatpush.bf16.msra.mxu0 %v1025_v45 }
  0x51   : > { %1154 = vmatpush.bf16.msrb.mxu3 %v1053_v42 }
  0x54   : > { %745 = vmatpush.bf16.msra.mxu1 %v1053_v42 }
  0x9c   : > { %v262_v47 = vpop.f32.mrf.mxu0  ;;  %v281_v51 = vpop.f32.mrf.mxu1 }
  0x9d   : > { %v263_v1 = vadd.f32 %v262_v47, %v227_v58  ;;  %v282_v3 = vadd.f32 %v281_v51, %v228_v61  ;;  %v1122_v47 = vld [vmem:[#allocation2 + $0xe8] sm:$0xf0]  ;;  %v1021_v51 = vor.u32 %v1115_v50, %v1020_v49 }
  0x9e   : > { %v1049_v48 = vor.u32 %v1122_v47, %v1048_v46  ;;  %v1211_v46 = vld [vmem:[%s1474_s3 + $0x4] ss:$0 sm:$0xff] }
  0x9f   : > { %v291_v10 = vmax.f32 %v263_v1, 0.0  ;;  %v292_v12 = vmax.f32 %v282_v3, 0.0  ;;  %726 = vmatpush.bf16.msra.mxu0 %v1021_v51  ;;  %1146 = vmatpush.bf16.msrb.mxu2 %v1021_v51 }
  0xa0   : > { %746 = vmatpush.bf16.msra.mxu1 %v1049_v48  ;;  %1155 = vmatpush.bf16.msrb.mxu3 %v1049_v48 }
  0xa3   : > { %727 = vmatpush.bf16.msra.mxu0 %v1017_v57  ;;  %1147 = vmatpush.bf16.msrb.mxu2 %v1017_v57 }
  0xa4   : > { %v264_v4 = vpop.f32.mrf.mxu0  ;;  %v283_v6 = vpop.f32.mrf.mxu1  ;;  %747 = vmatpush.bf16.msra.mxu1 %v1045_v54  ;;  %1156 = vmatpush.bf16.msrb.mxu3 %v1045_v54 }
  0xa5   : > { %v265_v5 = vadd.f32 %v264_v4, %v227_v58  ;;  %v284_v7 = vadd.f32 %v283_v6, %v228_v61 }
  0xa7   : > { %v293_v11 = vmax.f32 %v265_v5, 0.0  ;;  %v294_v13 = vmax.f32 %v284_v7, 0.0 }
  0xa9   : > { %v299_v14 = vpack.c.bf16 %v293_v11, %v291_v10  ;;  %v300_v16 = vpack.c.bf16 %v294_v13, %v292_v12 }
  0xab   : > { %509 = vmatmul.bf16.vlgmr.msra.gmra.mxu2 %v299_v14  ;;  %547 = vmatmul.bf16.vlgmr.msrb.gmra.mxu0 %v299_v14 }
  0xac   : > { %528 = vmatmul.bf16.vlgmr.msra.gmra.mxu3 %v300_v16  ;;  %566 = vmatmul.bf16.vlgmr.msrb.gmra.mxu1 %v300_v16  ;;  %v267_v17 = vpop.f32.mrf.mxu0  ;;  %v286_v18 = vpop.f32.mrf.mxu1 }
  0xad   : > { %v268_v19 = vadd.f32 %v267_v17, %v227_v58  ;;  %v287_v20 = vadd.f32 %v286_v18, %v228_v61 }
  0xaf   : > { %v295_v25 = vmax.f32 %v268_v19, 0.0  ;;  %v296_v27 = vmax.f32 %v287_v20, 0.0 }
  0xb4   : > { %v269_v21 = vpop.f32.mrf.mxu0  ;;  %v288_v23 = vpop.f32.mrf.mxu1 }
  0xb5   : > { %v270_v22 = vadd.f32 %v269_v21, %v227_v58  ;;  %v289_v24 = vadd.f32 %v288_v23, %v228_v61  ;;  %v1012_v58 = vld [vmem:[#allocation2 + $0x8] sm:$0xf]  ;;  %v335_v61 = vld [vmem:[%s1474_s3 + $0x2] sm:$0x3] }
  0xb6   : > { %v1013_v60 = vor.u32 %v1113_v59, %v1012_v58  ;;  %v338_v63 = vperm.slane %v335_v61, 1  ;;  %v337_v3 = vperm.slane %v335_v61, 0 }
  0xb7   : > { %v297_v26 = vmax.f32 %v270_v22, 0.0  ;;  %v298_v28 = vmax.f32 %v289_v24, 0.0 }
  0xb8   : > { %728 = vmatpush.bf16.msra.mxu0 %v1013_v60  ;;  %1148 = vmatpush.bf16.msrb.mxu2 %v1013_v60 }
  0xb9   : > { %v301_v29 = vpack.c.bf16 %v297_v26, %v295_v25  ;;  %v302_v30 = vpack.c.bf16 %v298_v28, %v296_v27 }
  0xbb   : > { %514 = vmatmul.bf16.gmra.mxu2 %v301_v29  ;;  %552 = vmatmul.bf16.gmra.mxu0 %v301_v29 }
  0xbc   : > { %533 = vmatmul.bf16.gmra.mxu3 %v302_v30  ;;  %571 = vmatmul.bf16.gmra.mxu1 %v302_v30 }
 0x128   : > { %v548_v62 = vpop.f32.mrf.mxu0 }
 0x129   : > { %v567_v0 = vpop.f32.mrf.mxu1  ;;  %v549_v1 = vadd.f32 %v548_v62, %v338_v63 }
 0x12b   : > { %v568_v6 = vadd.f32 %v567_v0, %v549_v1 }
 0x12d   : > { %v578_v11 = vmax.f32 %v568_v6, 0.0 }
 0x12e   : > { %v510_v2 = vpop.f32.mrf.mxu2 }
 0x12f   : > { %v529_v4 = vpop.f32.mrf.mxu3  ;;  %v511_v9 = vadd.f32 %v510_v2, %v337_v3 }
 0x130   : > { %v550_v5 = vpop.f32.mrf.mxu0 }
 0x131   : > { %v551_v7 = vadd.f32 %v550_v5, %v338_v63  ;;  %v569_v8 = vpop.f32.mrf.mxu1  ;;  %v530_v14 = vadd.f32 %v529_v4, %v511_v9 }
 0x133   : > { %v570_v10 = vadd.f32 %v569_v8, %v551_v7  ;;  %v577_v21 = vmax.f32 %v530_v14, 0.0 }
 0x135   : > { %v580_v12 = vmax.f32 %v570_v10, 0.0 }
 0x136   : > { %v512_v13 = vpop.f32.mrf.mxu2 }
 0x137   : > { %v586_v15 = vpack.c.bf16 %v580_v12, %v578_v11  ;;  %v513_v16 = vadd.f32 %v512_v13, %v337_v3  ;;  %v531_v17 = vpop.f32.mrf.mxu3 }
 0x138   : > { %v553_v18 = vpop.f32.mrf.mxu0 }
 0x139   : > { %v532_v19 = vadd.f32 %v531_v17, %v513_v16  ;;  %v572_v20 = vpop.f32.mrf.mxu1  ;;  %748 = vmatmul.bf16.vlgmr.msra.gmra.mxu1 %v586_v15  ;;  %v554_v24 = vadd.f32 %v553_v18, %v338_v63 }
 0x13b   : > { %v579_v22 = vmax.f32 %v532_v19, 0.0  ;;  %v573_v28 = vadd.f32 %v572_v20, %v554_v24 }
 0x13d   : > { %v585_v23 = vpack.c.bf16 %v579_v22, %v577_v21  ;;  %v582_v33 = vmax.f32 %v573_v28, 0.0 }
 0x13e   : > { %v515_v25 = vpop.f32.mrf.mxu2 }
 0x13f   : > { %v534_v26 = vpop.f32.mrf.mxu3  ;;  %729 = vmatmul.bf16.vlgmr.msra.gmra.mxu0 %v585_v23  ;;  %v516_v31 = vadd.f32 %v515_v25, %v337_v3 }
 0x140   : > { %v555_v27 = vpop.f32.mrf.mxu0 }
 0x141   : > { %v556_v29 = vadd.f32 %v555_v27, %v338_v63  ;;  %v574_v30 = vpop.f32.mrf.mxu1  ;;  %v535_v36 = vadd.f32 %v534_v26, %v516_v31 }
 0x143   : > { %v575_v32 = vadd.f32 %v574_v30, %v556_v29  ;;  %v581_v41 = vmax.f32 %v535_v36, 0.0 }
 0x145   : > { %v584_v34 = vmax.f32 %v575_v32, 0.0 }
 0x146   : > { %v517_v35 = vpop.f32.mrf.mxu2 }
 0x147   : > { %v588_v37 = vpack.c.bf16 %v584_v34, %v582_v33  ;;  %v518_v38 = vadd.f32 %v517_v35, %v337_v3  ;;  %v536_v39 = vpop.f32.mrf.mxu3 }
 0x149   : > { %v537_v40 = vadd.f32 %v536_v39, %v518_v38  ;;  %753 = vmatmul.bf16.vlgmr.msrb.gmra.mxu3 %v588_v37 }
 0x14b   : > { %v583_v42 = vmax.f32 %v537_v40, 0.0 }
 0x14d   : > { %v587_v43 = vpack.c.bf16 %v583_v42, %v581_v41 }
 0x14f   : > { %734 = vmatmul.bf16.vlgmr.msrb.gmra.mxu2 %v587_v43 }
 0x1b6   : > { %v749_v44 = vpop.f32.mrf.mxu1 }
 0x1bc   : > { %v730_v45 = vpop.f32.mrf.mxu0 }
 0x1bd   : > { %v731_v47 = vadd.f32 %v1211_v46, %v730_v45 }
 0x1be   : > { %v751_v51 = vpop.f32.mrf.mxu1 }
 0x1bf   : > { %v750_v49 = vadd.f32 %v749_v44, %v731_v47 }
 0x1c1   : > { %v759_v53 = vmax.f32 %v750_v49, 0.0 }
 0x1c4   : > { %v732_v48 = vpop.f32.mrf.mxu0 }
 0x1c5   : > { %v733_v50 = vadd.f32 %v1211_v46, %v732_v48 }
 0x1c7   : > { %v752_v52 = vadd.f32 %v751_v51, %v733_v50 }
 0x1c9   : > { %v760_v54 = vmax.f32 %v752_v52, 0.0 }
 0x1cb   : > { %v1133_v55 = vpack.c.bf16 %v760_v54, %v759_v53 }
 0x1cc   : > { %v754_v56 = vpop.f32.mrf.mxu3 }
 0x1cd   : > { %1134 = vst [vmem:[%s208_s12] sm:$0xff] %v1133_v55  }
 0x1d2   : > { %v735_v57 = vpop.f32.mrf.mxu2 }
 0x1d3   : > { %v736_v58 = vadd.f32 %v1211_v46, %v735_v57 }
 0x1d4   : > { %v756_v62 = vpop.f32.mrf.mxu3 }
 0x1d5   : > { %v755_v60 = vadd.f32 %v754_v56, %v736_v58 }
 0x1d7   : > { %v761_v0 = vmax.f32 %v755_v60, 0.0 }
 0x1da   : > { %v737_v59 = vpop.f32.mrf.mxu2 }
 0x1db   : > { %v738_v61 = vadd.f32 %v1211_v46, %v737_v59 }
 0x1dd   : > { %v757_v63 = vadd.f32 %v756_v62, %v738_v61 }
 0x1df   : > { %v762_v1 = vmax.f32 %v757_v63, 0.0 }
 0x1e1   : > { %v1138_v2 = vpack.c.bf16 %v762_v1, %v761_v0 }
 0x1e3   : > { %1140 = vst [vmem:[%s208_s12 + $0x8] sm:$0xff] %v1138_v2  }
 0x1e4   : > { %1269 = shalt.err (!%p1266_p8)
}
 0x1e5   : > { %s1313_s9 = smov 64   ;;  %s1314_s10 = smov 4  }
 0x1e6   : > { %1161 = dma.vmem_to_hbm [thread:$0]  (%p1378_p5), %s785_s23, 256, %s787_s27, %s772_s19, %s1313_s9, %s1313_s9, %s1314_s10  }
 0x1e7 PF: > { %p1173_p9 = scmp.ge.s32.totalorder %s1308_s18, 2  ;;  %s801_s11 = sand.u32 1, %s1296_s15  }
 0x1e8   : > { %s802_s12 = scalar_lea.sflag [#allocation4], %s801_s11 }
 0x1e9   : > { %p1168_p10 = pnand %p1173_p9, %p1382_p6 }
 0x1eb   : > { %p1169_p11 = pneg %p1168_p10 }
 0x1ed   : > { %1291 = dma.done.wait (%p1169_p11), %s802_s12, 256  }
 0x1ee   : > { %1293 = vsyncadd (%p1169_p11), %s802_s12, 4294967040  ;;  %p15_p12 = scmp.ge.s32.totalorder %s1365_s21, 4   ;;  %s1478_s15 = smov %s1300_s16 }
 0x1ef   : > { %s1479_s16 = smov %s1304_s17  ;;  %s1480_s17 = smov %s1376_s24 }
 0x1f0   : > { %s1481_s18 = smov %s1365_s21  ;;  %17 = sbr.rel (!%p15_p12) target bundleno = 4 (0x4), region = 76 }
 0x1f5   :  { %808 = vsyncpa [#allocation3], 1 }
 0x1f6   :  { %810 = vsyncpa [#allocation3 + $0x1], 1 }
 0x1f7   :  { %811 = vsyncpa [#allocation4], 1 }
 0x1f8   :  { %813 = vsyncpa [#allocation4 + $0x1], 1 }

</bundles_post_ra>
